<compile_context>
chip_gen: v7x
topology: tpu7x:2x2x1
jax: 0.10.0
libtpu: 0.0.40
codegen_flags: <defaults>
</compile_context>

<pallas_src>
import math
import functools

import jax
import jax.numpy as jnp
import numpy as np
from jax import lax
from jax.experimental import pallas as pl
from jax.experimental.pallas import tpu as pltpu


def _rmsnorm(v, eps=1e-6):
    vf = v.astype(jnp.float32)
    return (vf * lax.rsqrt(jnp.mean(vf * vf, axis=-1, keepdims=True) + eps)).astype(v.dtype)


def _gelu_exact(v):
    # matches torch.nn.functional.gelu default (erf form)
    return 0.5 * v * (1.0 + lax.erf(v * (1.0 / math.sqrt(2.0))))


def _pick_tile(n, max_tile=256):
    """Largest tile <= max_tile that divides n (multiple of 8), else full n."""
    if n <= max_tile:
        return n
    t = max_tile
    while t >= 8:
        if n % t == 0:
            return t
        t -= 8
    return n


# ----------------------------------------------------------------------------
# Kernel 1: rmsnorm -> QKV projection -> RoPE, head-major bf16 outputs.
# ----------------------------------------------------------------------------
def qkv_rope_kernel(x_ref, wqkv_ref, cos_ref, sin_ref, q_ref, k_ref, v_ref,
                    *, n_head, head_dim):
    x = x_ref[0]                        # (TQ, C) f32
    C = x.shape[1]
    hd = head_dim
    hd2 = hd // 2
    sm_scale = 1.0 / math.sqrt(hd)

    h = _rmsnorm(x)
    # bf16 MXU inputs, f32 accumulation.
    qkv = jnp.dot(h.astype(jnp.bfloat16), wqkv_ref[...],
                  preferred_element_type=jnp.float32)        # (TQ, 3C) f32

    cos = cos_ref[...]                  # (TQ, hd2) f32
    sin = sin_ref[...]

    def rope(u):                        # u: (TQ, hd) f32
        u1, u2 = u[:, :hd2], u[:, hd2:]
        return jnp.concatenate([u1 * cos + u2 * sin, -u1 * sin + u2 * cos], axis=-1)

    # Per-head layout shuffle done once here (cheap O(T*C) kernel) so the
    # O(T^2) attention kernel gets a clean head-major layout.  Q is pre-scaled
    # by 1/sqrt(head_dim) in f32 so kernel 2 never touches the score scale.
    for hh in range(n_head):
        qh = rope(qkv[:, hh * hd:(hh + 1) * hd]) * sm_scale
        q_ref[0, hh] = qh.astype(q_ref.dtype)
        k_ref[0, hh] = rope(qkv[:, C + hh * hd:C + (hh + 1) * hd]).astype(k_ref.dtype)
        v_ref[0, hh] = qkv[:, 2 * C + hh * hd:2 * C + (hh + 1) * hd].astype(v_ref.dtype)


# ----------------------------------------------------------------------------
# Kernel 2: flash attention (online softmax) + wo proj + residual + rmsnorm +
#           MLP(gelu) + residual, per query-row tile.
# ----------------------------------------------------------------------------
def attn_mlp_kernel(x_ref, q_ref, k_ref, v_ref, wo_ref, wfc_ref, wpr_ref,
                    o_ref, m_ref, l_ref, acc_ref,
                    *, n_head, head_dim, attn_scale):
    qi = pl.program_id(1)
    kj = pl.program_id(2)
    TQ = q_ref.shape[2]
    TK = k_ref.shape[2]

    @pl.when(kj == 0)
    def _init():
        m_ref[...] = jnp.full(m_ref.shape, -jnp.inf, dtype=m_ref.dtype)
        l_ref[...] = jnp.zeros(l_ref.shape, dtype=l_ref.dtype)
        acc_ref[...] = jnp.zeros(acc_ref.shape, dtype=acc_ref.dtype)

    # Causal: with TK == TQ, KV tiles with kj > qi are fully masked -> skip.
    @pl.when(kj <= qi)
    def _update():
        q = q_ref[0]                    # (h, TQ, d) bf16 (already 1/sqrt(d) scaled)
        k = k_ref[0]                    # (h, TK, d) bf16
        v = v_ref[0]                    # (h, TK, d) bf16

        # Batched over heads; contraction over d consumes K in stored layout.
        s = jnp.einsum('hqd,hkd->hqk', q, k,
                       preferred_element_type=jnp.float32)   # (h, TQ, TK) f32

        row = qi * TQ + lax.broadcasted_iota(jnp.int32, (TQ, TK), 0)
        col = kj * TK + lax.broadcasted_iota(jnp.int32, (TQ, TK), 1)
        s = jnp.where((col <= row)[None, :, :], s, -1e30)

        m_prev = m_ref[...]
        m_new = jnp.maximum(m_prev, jnp.max(s, axis=-1, keepdims=True))
        alpha = jnp.exp(m_prev - m_new)
        p = jnp.exp(s - m_new)                                  # (h, TQ, TK) f32
        l_ref[...] = alpha * l_ref[...] + jnp.sum(p, axis=-1, keepdims=True)
        acc_ref[...] = alpha * acc_ref[...] + jnp.einsum(
            'hqk,hkd->hqd', p.astype(v.dtype), v,
            preferred_element_type=jnp.float32)
        m_ref[...] = m_new

    @pl.when(kj == pl.num_programs(2) - 1)
    def _finalize():
        x_tile = x_ref[0]                                        # (TQ, C) f32
        # EUP approx reciprocal instead of a divide.
        y = acc_ref[...] * pl.reciprocal(l_ref[...], approx=True)  # (h, TQ, d) f32
        # Merge heads once per tile (outside the KV loop), then dense matmuls.
        y2d = jnp.concatenate([y[hh] for hh in range(n_head)],
                              axis=-1).astype(jnp.bfloat16)      # (TQ, C)
        attn = jnp.dot(y2d, wo_ref[...], preferred_element_type=jnp.float32)
        x1 = x_tile + attn_scale * attn                          # residual in f32

        h2 = _rmsnorm(x1)
        ff = jnp.dot(h2.astype(jnp.bfloat16), wfc_ref[...],
                     preferred_element_type=jnp.float32)
        ff = _gelu_exact(ff)
        out = x1 + jnp.dot(ff.astype(jnp.bfloat16), wpr_ref[...],
                           preferred_element_type=jnp.float32)
        o_ref[0] = out.astype(o_ref.dtype)


# ----------------------------------------------------------------------------
# Wrapper
# ----------------------------------------------------------------------------
def block_forward(x, params, *, n_head, n_layer, max_tile=256):
    B, T, C = x.shape
    hd = C // n_head
    hd2 = hd // 2
    attn_scale = 1.0 / math.sqrt(2 * n_layer)
    wqkv, wo, wfc, wpr = params

    bf16 = jnp.bfloat16
    wqkv_b = wqkv.astype(bf16)
    wo_b = wo.astype(bf16)
    wfc_b = wfc.astype(bf16)
    wpr_b = wpr.astype(bf16)

    # Rotary tables (glue, plain JAX).
    inv_freq = 1.0 / (10000.0 ** (jnp.arange(0, hd, 2, dtype=jnp.float32) / hd))
    freqs = jnp.outer(jnp.arange(T, dtype=jnp.float32), inv_freq)
    cos = jnp.cos(freqs)
    sin = jnp.sin(freqs)

    TQ = _pick_tile(T, max_tile)
    TK = TQ
    nq = T // TQ
    nk = T // TK
    vmem_limit = 64 * 1024 * 1024   # raised above 16/32 MiB scoped defaults
    # NOTE: on v7x with very large C, additionally tile wfc/wpr along 4C and
    # single-buffer the grid-invariant weight specs to stay under 64 MiB.

    # --- Kernel 1: QKV + RoPE ------------------------------------------------
    k1 = functools.partial(qkv_rope_kernel, n_head=n_head, head_dim=hd)
    qkv_out_shapes = tuple(jax.ShapeDtypeStruct((B, n_head, T, hd), bf16)
                           for _ in range(3))
    q, k, v = pl.pallas_call(
        k1,
        out_shape=qkv_out_shapes,
        grid_spec=pltpu.PrefetchScalarGridSpec(
            num_scalar_prefetch=0,
            grid=(B, nq),
            in_specs=[
                pl.BlockSpec((1, TQ, C), lambda b, i: (b, i, 0)),
                pl.BlockSpec((C, 3 * C), lambda b, i: (0, 0)),
                pl.BlockSpec((TQ, hd2), lambda b, i: (i, 0)),
                pl.BlockSpec((TQ, hd2), lambda b, i: (i, 0)),
            ],
            out_specs=[
                pl.BlockSpec((1, n_head, TQ, hd), lambda b, i: (b, 0, i, 0)),
                pl.BlockSpec((1, n_head, TQ, hd), lambda b, i: (b, 0, i, 0)),
                pl.BlockSpec((1, n_head, TQ, hd), lambda b, i: (b, 0, i, 0)),
            ],
        ),
        compiler_params=pltpu.CompilerParams(
            dimension_semantics=("parallel", "parallel"),
            vmem_limit_bytes=vmem_limit),
    )(x, wqkv_b, cos, sin)

    # --- Kernel 2: flash attention + projection + MLP ------------------------
    k2 = functools.partial(attn_mlp_kernel, n_head=n_head, head_dim=hd,
                           attn_scale=attn_scale)
    out = pl.pallas_call(
        k2,
        out_shape=jax.ShapeDtypeStruct((B, T, C), x.dtype),
        grid_spec=pltpu.PrefetchScalarGridSpec(
            num_scalar_prefetch=0,
            grid=(B, nq, nk),
            in_specs=[
                pl.BlockSpec((1, TQ, C), lambda b, i, j: (b, i, 0)),
                pl.BlockSpec((1, n_head, TQ, hd), lambda b, i, j: (b, 0, i, 0)),
                # Clamp KV block index for fully-masked tiles -> no extra DMA.
                pl.BlockSpec((1, n_head, TK, hd),
                             lambda b, i, j: (b, 0, jnp.minimum(j, i), 0)),
                pl.BlockSpec((1, n_head, TK, hd),
                             lambda b, i, j: (b, 0, jnp.minimum(j, i), 0)),
                pl.BlockSpec((C, C), lambda b, i, j: (0, 0)),
                pl.BlockSpec((C, 4 * C), lambda b, i, j: (0, 0)),
                pl.BlockSpec((4 * C, C), lambda b, i, j: (0, 0)),
            ],
            out_specs=pl.BlockSpec((1, TQ, C), lambda b, i, j: (b, i, 0)),
            scratch_shapes=[
                pltpu.VMEM((n_head, TQ, 1), jnp.float32),   # running max m
                pltpu.VMEM((n_head, TQ, 1), jnp.float32),   # running sum l
                pltpu.VMEM((n_head, TQ, hd), jnp.float32),  # output accumulator
            ],
        ),
        compiler_params=pltpu.CompilerParams(
            dimension_semantics=("parallel", "parallel", "arbitrary"),
            vmem_limit_bytes=vmem_limit),
    )(x, q, k, v, wo_b, wfc_b, wpr_b)
    return out


# ----------------------------------------------------------------------------
# Pure-JAX f32 reference of the PyTorch Block.forward
# ----------------------------------------------------------------------------
def block_reference(x, params, *, n_head, n_layer):
    wqkv, wo, wfc, wpr = params
    B, T, C = x.shape
    head_dim = C // n_head
    attn_scale = 1.0 / math.sqrt(2 * n_layer)

    inv_freq = 1.0 / (10000.0 ** (jnp.arange(0, head_dim, 2, dtype=jnp.float32) / head_dim))
    freqs = jnp.outer(jnp.arange(T, dtype=jnp.float32), inv_freq)
    cos = jnp.cos(freqs)[None, :, None, :]
    sin = jnp.sin(freqs)[None, :, None, :]

    h = _rmsnorm(x)
    qkv = h @ wqkv
    q, k, v = jnp.split(qkv, 3, axis=-1)
    q = q.reshape(B, T, n_head, head_dim)
    k = k.reshape(B, T, n_head, head_dim)
    v = v.reshape(B, T, n_head, head_dim)

    def rope4(u):
        d = head_dim // 2
        u1, u2 = u[..., :d], u[..., d:]
        return jnp.concatenate([u1 * cos + u2 * sin, -u1 * sin + u2 * cos], axis=-1)

    q = rope4(q)
    k = rope4(k)
    s = jnp.einsum('bthd,bshd->bhts', q, k) / math.sqrt(head_dim)
    mask = jnp.tril(jnp.ones((T, T), dtype=bool))
    s = jnp.where(mask[None, None], s, -1e30)
    p = jax.nn.softmax(s, axis=-1)
    y = jnp.einsum('bhts,bshd->bthd', p, v).reshape(B, T, C)
    x1 = x + attn_scale * (y @ wo)
    h2 = _rmsnorm(x1)
    ff = _gelu_exact(h2 @ wfc)
    return x1 + ff @ wpr


if __name__ == "__main__":
    # Small config consistent with the module (GPTConfig-like).
    B, T = 2, 8
    n_embd, n_head, n_layer = 32, 4, 2
    C = n_embd

    key = jax.random.PRNGKey(0)
    kx, k1, k2, k3, k4 = jax.random.split(key, 5)

    def init_linear(k, fan_in, fan_out):
        bound = 1.0 / math.sqrt(fan_in)
        # stored as (in, out) so the kernels compute x @ W
        return jax.random.uniform(k, (fan_in, fan_out), jnp.float32, -bound, bound)

    x = jax.random.normal(kx, (B, T, C), dtype=jnp.float32)
    params = (
        init_linear(k1, C, 3 * C),       # c_attn
        init_linear(k2, C, C),           # attn c_proj
        init_linear(k3, C, 4 * C),       # mlp c_fc
        init_linear(k4, 4 * C, C),       # mlp c_proj
    )

    out = block_forward(x, params, n_head=n_head, n_layer=n_layer)
    out = jax.block_until_ready(out)

    ref = jax.block_until_ready(block_reference(x, params, n_head=n_head, n_layer=n_layer))

    assert out.shape == (B, T, C), out.shape
    assert bool(jnp.all(jnp.isfinite(out)))
    # bf16 MXU inputs (f32 accumulation/stats/residuals) -> slightly looser tol.
    np.testing.assert_allclose(np.asarray(out), np.asarray(ref), rtol=2e-2, atol=2e-2)
    print("KERNEL_OK")
</pallas_src>

<mosaic_0001>
module attributes {stable_mosaic.version = 11 : i64} {
  func.func @qkv_rope_kernel(%arg0: i32, %arg1: i32, %arg2: memref<1x8x32xf32, #tpu.memory_space<vmem>>, %arg3: memref<32x96xbf16, #tpu.memory_space<vmem>>, %arg4: memref<8x4xf32, #tpu.memory_space<vmem>>, %arg5: memref<8x4xf32, #tpu.memory_space<vmem>>, %arg6: memref<1x4x8x8xbf16, #tpu.memory_space<vmem>>, %arg7: memref<1x4x8x8xbf16, #tpu.memory_space<vmem>>, %arg8: memref<1x4x8x8xbf16, #tpu.memory_space<vmem>>) attributes {dimension_semantics = [#tpu.dimension_semantics<parallel>, #tpu.dimension_semantics<parallel>], iteration_bounds = array<i64: 2, 1>, scalar_prefetch = 0 : i64, scratch_operands = 0 : i64, tpu.core_type = #tpu.core_type<tc>, window_params = [{transform_indices = @transform_0, window_bounds = array<i64: 1, 8, 32>}, {pipeline_mode = #tpu.pipeline_mode<synchronous>, transform_indices = @transform_1, window_bounds = array<i64: 32, 96>}, {transform_indices = @transform_2, window_bounds = array<i64: 8, 4>}, {transform_indices = @transform_3, window_bounds = array<i64: 8, 4>}, {transform_indices = @transform_4, window_bounds = array<i64: 1, 4, 8, 8>}, {transform_indices = @transform_5, window_bounds = array<i64: 1, 4, 8, 8>}, {transform_indices = @transform_6, window_bounds = array<i64: 1, 4, 8, 8>}]} {
    %c0 = arith.constant 0 : index
    %c0_0 = arith.constant 0 : index
    %c0_1 = arith.constant 0 : index
    %0 = vector.load %arg2[%c0, %c0_0, %c0_1] : memref<1x8x32xf32, #tpu.memory_space<vmem>>, vector<1x8x32xf32>
    %1 = vector.shape_cast %0 : vector<1x8x32xf32> to vector<8x32xf32>
    %2 = arith.mulf %1, %1 : vector<8x32xf32>
    %cst = arith.constant dense<0.000000e+00> : vector<8xf32>
    %3 = vector.multi_reduction <add>, %2, %cst [1] : vector<8x32xf32> to vector<8xf32>
    %4 = vector.shape_cast %3 : vector<8xf32> to vector<8x1xf32>
    %cst_2 = arith.constant 3.200000e+01 : f32
    %5 = vector.broadcast %cst_2 : f32 to vector<8x1xf32>
    %6 = arith.divf %4, %5 : vector<8x1xf32>
    %cst_3 = arith.constant 9.99999997E-7 : f32
    %7 = vector.broadcast %cst_3 : f32 to vector<8x1xf32>
    %8 = arith.addf %6, %7 : vector<8x1xf32>
    %9 = math.rsqrt %8 : vector<8x1xf32>
    %10 = vector.broadcast %9 : vector<8x1xf32> to vector<8x32xf32>
    %11 = arith.mulf %1, %10 : vector<8x32xf32>
    %12 = arith.truncf %11 : vector<8x32xf32> to vector<8x32xbf16>
    %c0_4 = arith.constant 0 : index
    %c0_5 = arith.constant 0 : index
    %13 = vector.load %arg3[%c0_4, %c0_5] : memref<32x96xbf16, #tpu.memory_space<vmem>>, vector<32x96xbf16>
    %cst_6 = arith.constant dense<0.000000e+00> : vector<8x96xf32>
    %14 = tpu.matmul %12, %13, %cst_6 {dimension_numbers = #tpu.dot_dimension_numbers<[1], [0], [0], [1], [0, 0, 1, 1], [], []>} : vector<8x32xbf16>, vector<32x96xbf16>, vector<8x96xf32> -> vector<8x96xf32>
    %c0_7 = arith.constant 0 : index
    %c0_8 = arith.constant 0 : index
    %15 = vector.load %arg4[%c0_7, %c0_8] : memref<8x4xf32, #tpu.memory_space<vmem>>, vector<8x4xf32>
    %c0_9 = arith.constant 0 : index
    %c0_10 = arith.constant 0 : index
    %16 = vector.load %arg5[%c0_9, %c0_10] : memref<8x4xf32, #tpu.memory_space<vmem>>, vector<8x4xf32>
    %17 = vector.extract_strided_slice %14 {offsets = [0, 0], sizes = [8, 8], strides = [1, 1]} : vector<8x96xf32> to vector<8x8xf32>
    %18 = vector.extract_strided_slice %17 {offsets = [0, 0], sizes = [8, 4], strides = [1, 1]} : vector<8x8xf32> to vector<8x4xf32>
    %19 = vector.extract_strided_slice %17 {offsets = [0, 4], sizes = [8, 4], strides = [1, 1]} : vector<8x8xf32> to vector<8x4xf32>
    %20 = arith.mulf %18, %15 : vector<8x4xf32>
    %21 = arith.mulf %19, %16 : vector<8x4xf32>
    %22 = arith.addf %20, %21 : vector<8x4xf32>
    %cst_11 = arith.constant 0.000000e+00 : f32
    %23 = vector.broadcast %cst_11 : f32 to vector<8x4xf32>
    %24 = arith.subf %23, %18 : vector<8x4xf32>
    %25 = arith.mulf %24, %16 : vector<8x4xf32>
    %26 = arith.mulf %19, %15 : vector<8x4xf32>
    %27 = arith.addf %25, %26 : vector<8x4xf32>
    %28 = tpu.concatenate %22, %27 in 1 : vector<8x4xf32>, vector<8x4xf32> -> vector<8x8xf32>
    %cst_12 = arith.constant 0.353553385 : f32
    %29 = vector.broadcast %cst_12 : f32 to vector<8x8xf32>
    %30 = arith.mulf %28, %29 : vector<8x8xf32>
    %31 = arith.truncf %30 : vector<8x8xf32> to vector<8x8xbf16>
    %c0_13 = arith.constant 0 : index
    %c0_14 = arith.constant 0 : index
    %c0_15 = arith.constant 0 : index
    %c0_16 = arith.constant 0 : index
    %32 = vector.load %arg6[%c0_13, %c0_14, %c0_15, %c0_16] : memref<1x4x8x8xbf16, #tpu.memory_space<vmem>>, vector<1x1x8x8xbf16>
    %33 = vector.shape_cast %32 : vector<1x1x8x8xbf16> to vector<8x8xbf16>
    %34 = vector.shape_cast %31 : vector<8x8xbf16> to vector<1x1x8x8xbf16>
    tpu.vector_store %arg6[%c0_13, %c0_14, %c0_15, %c0_16], %34 {strides = array<i32>} : memref<1x4x8x8xbf16, #tpu.memory_space<vmem>>, vector<1x1x8x8xbf16>,
    %35 = vector.extract_strided_slice %14 {offsets = [0, 32], sizes = [8, 8], strides = [1, 1]} : vector<8x96xf32> to vector<8x8xf32>
    %36 = vector.extract_strided_slice %35 {offsets = [0, 0], sizes = [8, 4], strides = [1, 1]} : vector<8x8xf32> to vector<8x4xf32>
    %37 = vector.extract_strided_slice %35 {offsets = [0, 4], sizes = [8, 4], strides = [1, 1]} : vector<8x8xf32> to vector<8x4xf32>
    %38 = arith.mulf %36, %15 : vector<8x4xf32>
    %39 = arith.mulf %37, %16 : vector<8x4xf32>
    %40 = arith.addf %38, %39 : vector<8x4xf32>
    %cst_17 = arith.constant 0.000000e+00 : f32
    %41 = vector.broadcast %cst_17 : f32 to vector<8x4xf32>
    %42 = arith.subf %41, %36 : vector<8x4xf32>
    %43 = arith.mulf %42, %16 : vector<8x4xf32>
    %44 = arith.mulf %37, %15 : vector<8x4xf32>
    %45 = arith.addf %43, %44 : vector<8x4xf32>
    %46 = tpu.concatenate %40, %45 in 1 : vector<8x4xf32>, vector<8x4xf32> -> vector<8x8xf32>
    %47 = arith.truncf %46 : vector<8x8xf32> to vector<8x8xbf16>
    %c0_18 = arith.constant 0 : index
    %c0_19 = arith.constant 0 : index
    %c0_20 = arith.constant 0 : index
    %c0_21 = arith.constant 0 : index
    %48 = vector.load %arg7[%c0_18, %c0_19, %c0_20, %c0_21] : memref<1x4x8x8xbf16, #tpu.memory_space<vmem>>, vector<1x1x8x8xbf16>
    %49 = vector.shape_cast %48 : vector<1x1x8x8xbf16> to vector<8x8xbf16>
    %50 = vector.shape_cast %47 : vector<8x8xbf16> to vector<1x1x8x8xbf16>
    tpu.vector_store %arg7[%c0_18, %c0_19, %c0_20, %c0_21], %50 {strides = array<i32>} : memref<1x4x8x8xbf16, #tpu.memory_space<vmem>>, vector<1x1x8x8xbf16>,
    %51 = vector.extract_strided_slice %14 {offsets = [0, 64], sizes = [8, 8], strides = [1, 1]} : vector<8x96xf32> to vector<8x8xf32>
    %52 = arith.truncf %51 : vector<8x8xf32> to vector<8x8xbf16>
    %c0_22 = arith.constant 0 : index
    %c0_23 = arith.constant 0 : index
    %c0_24 = arith.constant 0 : index
    %c0_25 = arith.constant 0 : index
    %53 = vector.load %arg8[%c0_22, %c0_23, %c0_24, %c0_25] : memref<1x4x8x8xbf16, #tpu.memory_space<vmem>>, vector<1x1x8x8xbf16>
    %54 = vector.shape_cast %53 : vector<1x1x8x8xbf16> to vector<8x8xbf16>
    %55 = vector.shape_cast %52 : vector<8x8xbf16> to vector<1x1x8x8xbf16>
    tpu.vector_store %arg8[%c0_22, %c0_23, %c0_24, %c0_25], %55 {strides = array<i32>} : memref<1x4x8x8xbf16, #tpu.memory_space<vmem>>, vector<1x1x8x8xbf16>,
    %56 = vector.extract_strided_slice %14 {offsets = [0, 8], sizes = [8, 8], strides = [1, 1]} : vector<8x96xf32> to vector<8x8xf32>
    %57 = vector.extract_strided_slice %56 {offsets = [0, 0], sizes = [8, 4], strides = [1, 1]} : vector<8x8xf32> to vector<8x4xf32>
    %58 = vector.extract_strided_slice %56 {offsets = [0, 4], sizes = [8, 4], strides = [1, 1]} : vector<8x8xf32> to vector<8x4xf32>
    %59 = arith.mulf %57, %15 : vector<8x4xf32>
    %60 = arith.mulf %58, %16 : vector<8x4xf32>
    %61 = arith.addf %59, %60 : vector<8x4xf32>
    %cst_26 = arith.constant 0.000000e+00 : f32
    %62 = vector.broadcast %cst_26 : f32 to vector<8x4xf32>
    %63 = arith.subf %62, %57 : vector<8x4xf32>
    %64 = arith.mulf %63, %16 : vector<8x4xf32>
    %65 = arith.mulf %58, %15 : vector<8x4xf32>
    %66 = arith.addf %64, %65 : vector<8x4xf32>
    %67 = tpu.concatenate %61, %66 in 1 : vector<8x4xf32>, vector<8x4xf32> -> vector<8x8xf32>
    %cst_27 = arith.constant 0.353553385 : f32
    %68 = vector.broadcast %cst_27 : f32 to vector<8x8xf32>
    %69 = arith.mulf %67, %68 : vector<8x8xf32>
    %70 = arith.truncf %69 : vector<8x8xf32> to vector<8x8xbf16>
    %c0_28 = arith.constant 0 : index
    %c1 = arith.constant 1 : index
    %c0_29 = arith.constant 0 : index
    %c0_30 = arith.constant 0 : index
    %71 = vector.load %arg6[%c0_28, %c1, %c0_29, %c0_30] : memref<1x4x8x8xbf16, #tpu.memory_space<vmem>>, vector<1x1x8x8xbf16>
    %72 = vector.shape_cast %71 : vector<1x1x8x8xbf16> to vector<8x8xbf16>
    %73 = vector.shape_cast %70 : vector<8x8xbf16> to vector<1x1x8x8xbf16>
    tpu.vector_store %arg6[%c0_28, %c1, %c0_29, %c0_30], %73 {strides = array<i32>} : memref<1x4x8x8xbf16, #tpu.memory_space<vmem>>, vector<1x1x8x8xbf16>,
    %74 = vector.extract_strided_slice %14 {offsets = [0, 40], sizes = [8, 8], strides = [1, 1]} : vector<8x96xf32> to vector<8x8xf32>
    %75 = vector.extract_strided_slice %74 {offsets = [0, 0], sizes = [8, 4], strides = [1, 1]} : vector<8x8xf32> to vector<8x4xf32>
    %76 = vector.extract_strided_slice %74 {offsets = [0, 4], sizes = [8, 4], strides = [1, 1]} : vector<8x8xf32> to vector<8x4xf32>
    %77 = arith.mulf %75, %15 : vector<8x4xf32>
    %78 = arith.mulf %76, %16 : vector<8x4xf32>
    %79 = arith.addf %77, %78 : vector<8x4xf32>
    %cst_31 = arith.constant 0.000000e+00 : f32
    %80 = vector.broadcast %cst_31 : f32 to vector<8x4xf32>
    %81 = arith.subf %80, %75 : vector<8x4xf32>
    %82 = arith.mulf %81, %16 : vector<8x4xf32>
    %83 = arith.mulf %76, %15 : vector<8x4xf32>
    %84 = arith.addf %82, %83 : vector<8x4xf32>
    %85 = tpu.concatenate %79, %84 in 1 : vector<8x4xf32>, vector<8x4xf32> -> vector<8x8xf32>
    %86 = arith.truncf %85 : vector<8x8xf32> to vector<8x8xbf16>
    %c0_32 = arith.constant 0 : index
    %c1_33 = arith.constant 1 : index
    %c0_34 = arith.constant 0 : index
    %c0_35 = arith.constant 0 : index
    %87 = vector.load %arg7[%c0_32, %c1_33, %c0_34, %c0_35] : memref<1x4x8x8xbf16, #tpu.memory_space<vmem>>, vector<1x1x8x8xbf16>
    %88 = vector.shape_cast %87 : vector<1x1x8x8xbf16> to vector<8x8xbf16>
    %89 = vector.shape_cast %86 : vector<8x8xbf16> to vector<1x1x8x8xbf16>
    tpu.vector_store %arg7[%c0_32, %c1_33, %c0_34, %c0_35], %89 {strides = array<i32>} : memref<1x4x8x8xbf16, #tpu.memory_space<vmem>>, vector<1x1x8x8xbf16>,
    %90 = vector.extract_strided_slice %14 {offsets = [0, 72], sizes = [8, 8], strides = [1, 1]} : vector<8x96xf32> to vector<8x8xf32>
    %91 = arith.truncf %90 : vector<8x8xf32> to vector<8x8xbf16>
    %c0_36 = arith.constant 0 : index
    %c1_37 = arith.constant 1 : index
    %c0_38 = arith.constant 0 : index
    %c0_39 = arith.constant 0 : index
    %92 = vector.load %arg8[%c0_36, %c1_37, %c0_38, %c0_39] : memref<1x4x8x8xbf16, #tpu.memory_space<vmem>>, vector<1x1x8x8xbf16>
    %93 = vector.shape_cast %92 : vector<1x1x8x8xbf16> to vector<8x8xbf16>
    %94 = vector.shape_cast %91 : vector<8x8xbf16> to vector<1x1x8x8xbf16>
    tpu.vector_store %arg8[%c0_36, %c1_37, %c0_38, %c0_39], %94 {strides = array<i32>} : memref<1x4x8x8xbf16, #tpu.memory_space<vmem>>, vector<1x1x8x8xbf16>,
    %95 = vector.extract_strided_slice %14 {offsets = [0, 16], sizes = [8, 8], strides = [1, 1]} : vector<8x96xf32> to vector<8x8xf32>
    %96 = vector.extract_strided_slice %95 {offsets = [0, 0], sizes = [8, 4], strides = [1, 1]} : vector<8x8xf32> to vector<8x4xf32>
    %97 = vector.extract_strided_slice %95 {offsets = [0, 4], sizes = [8, 4], strides = [1, 1]} : vector<8x8xf32> to vector<8x4xf32>
    %98 = arith.mulf %96, %15 : vector<8x4xf32>
    %99 = arith.mulf %97, %16 : vector<8x4xf32>
    %100 = arith.addf %98, %99 : vector<8x4xf32>
    %cst_40 = arith.constant 0.000000e+00 : f32
    %101 = vector.broadcast %cst_40 : f32 to vector<8x4xf32>
    %102 = arith.subf %101, %96 : vector<8x4xf32>
    %103 = arith.mulf %102, %16 : vector<8x4xf32>
    %104 = arith.mulf %97, %15 : vector<8x4xf32>
    %105 = arith.addf %103, %104 : vector<8x4xf32>
    %106 = tpu.concatenate %100, %105 in 1 : vector<8x4xf32>, vector<8x4xf32> -> vector<8x8xf32>
    %cst_41 = arith.constant 0.353553385 : f32
    %107 = vector.broadcast %cst_41 : f32 to vector<8x8xf32>
    %108 = arith.mulf %106, %107 : vector<8x8xf32>
    %109 = arith.truncf %108 : vector<8x8xf32> to vector<8x8xbf16>
    %c0_42 = arith.constant 0 : index
    %c2 = arith.constant 2 : index
    %c0_43 = arith.constant 0 : index
    %c0_44 = arith.constant 0 : index
    %110 = vector.load %arg6[%c0_42, %c2, %c0_43, %c0_44] : memref<1x4x8x8xbf16, #tpu.memory_space<vmem>>, vector<1x1x8x8xbf16>
    %111 = vector.shape_cast %110 : vector<1x1x8x8xbf16> to vector<8x8xbf16>
    %112 = vector.shape_cast %109 : vector<8x8xbf16> to vector<1x1x8x8xbf16>
    tpu.vector_store %arg6[%c0_42, %c2, %c0_43, %c0_44], %112 {strides = array<i32>} : memref<1x4x8x8xbf16, #tpu.memory_space<vmem>>, vector<1x1x8x8xbf16>,
    %113 = vector.extract_strided_slice %14 {offsets = [0, 48], sizes = [8, 8], strides = [1, 1]} : vector<8x96xf32> to vector<8x8xf32>
    %114 = vector.extract_strided_slice %113 {offsets = [0, 0], sizes = [8, 4], strides = [1, 1]} : vector<8x8xf32> to vector<8x4xf32>
    %115 = vector.extract_strided_slice %113 {offsets = [0, 4], sizes = [8, 4], strides = [1, 1]} : vector<8x8xf32> to vector<8x4xf32>
    %116 = arith.mulf %114, %15 : vector<8x4xf32>
    %117 = arith.mulf %115, %16 : vector<8x4xf32>
    %118 = arith.addf %116, %117 : vector<8x4xf32>
    %cst_45 = arith.constant 0.000000e+00 : f32
    %119 = vector.broadcast %cst_45 : f32 to vector<8x4xf32>
    %120 = arith.subf %119, %114 : vector<8x4xf32>
    %121 = arith.mulf %120, %16 : vector<8x4xf32>
    %122 = arith.mulf %115, %15 : vector<8x4xf32>
    %123 = arith.addf %121, %122 : vector<8x4xf32>
    %124 = tpu.concatenate %118, %123 in 1 : vector<8x4xf32>, vector<8x4xf32> -> vector<8x8xf32>
    %125 = arith.truncf %124 : vector<8x8xf32> to vector<8x8xbf16>
    %c0_46 = arith.constant 0 : index
    %c2_47 = arith.constant 2 : index
    %c0_48 = arith.constant 0 : index
    %c0_49 = arith.constant 0 : index
    %126 = vector.load %arg7[%c0_46, %c2_47, %c0_48, %c0_49] : memref<1x4x8x8xbf16, #tpu.memory_space<vmem>>, vector<1x1x8x8xbf16>
    %127 = vector.shape_cast %126 : vector<1x1x8x8xbf16> to vector<8x8xbf16>
    %128 = vector.shape_cast %125 : vector<8x8xbf16> to vector<1x1x8x8xbf16>
    tpu.vector_store %arg7[%c0_46, %c2_47, %c0_48, %c0_49], %128 {strides = array<i32>} : memref<1x4x8x8xbf16, #tpu.memory_space<vmem>>, vector<1x1x8x8xbf16>,
    %129 = vector.extract_strided_slice %14 {offsets = [0, 80], sizes = [8, 8], strides = [1, 1]} : vector<8x96xf32> to vector<8x8xf32>
    %130 = arith.truncf %129 : vector<8x8xf32> to vector<8x8xbf16>
    %c0_50 = arith.constant 0 : index
    %c2_51 = arith.constant 2 : index
    %c0_52 = arith.constant 0 : index
    %c0_53 = arith.constant 0 : index
    %131 = vector.load %arg8[%c0_50, %c2_51, %c0_52, %c0_53] : memref<1x4x8x8xbf16, #tpu.memory_space<vmem>>, vector<1x1x8x8xbf16>
    %132 = vector.shape_cast %131 : vector<1x1x8x8xbf16> to vector<8x8xbf16>
    %133 = vector.shape_cast %130 : vector<8x8xbf16> to vector<1x1x8x8xbf16>
    tpu.vector_store %arg8[%c0_50, %c2_51, %c0_52, %c0_53], %133 {strides = array<i32>} : memref<1x4x8x8xbf16, #tpu.memory_space<vmem>>, vector<1x1x8x8xbf16>,
    %134 = vector.extract_strided_slice %14 {offsets = [0, 24], sizes = [8, 8], strides = [1, 1]} : vector<8x96xf32> to vector<8x8xf32>
    %135 = vector.extract_strided_slice %134 {offsets = [0, 0], sizes = [8, 4], strides = [1, 1]} : vector<8x8xf32> to vector<8x4xf32>
    %136 = vector.extract_strided_slice %134 {offsets = [0, 4], sizes = [8, 4], strides = [1, 1]} : vector<8x8xf32> to vector<8x4xf32>
    %137 = arith.mulf %135, %15 : vector<8x4xf32>
    %138 = arith.mulf %136, %16 : vector<8x4xf32>
    %139 = arith.addf %137, %138 : vector<8x4xf32>
    %cst_54 = arith.constant 0.000000e+00 : f32
    %140 = vector.broadcast %cst_54 : f32 to vector<8x4xf32>
    %141 = arith.subf %140, %135 : vector<8x4xf32>
    %142 = arith.mulf %141, %16 : vector<8x4xf32>
    %143 = arith.mulf %136, %15 : vector<8x4xf32>
    %144 = arith.addf %142, %143 : vector<8x4xf32>
    %145 = tpu.concatenate %139, %144 in 1 : vector<8x4xf32>, vector<8x4xf32> -> vector<8x8xf32>
    %cst_55 = arith.constant 0.353553385 : f32
    %146 = vector.broadcast %cst_55 : f32 to vector<8x8xf32>
    %147 = arith.mulf %145, %146 : vector<8x8xf32>
    %148 = arith.truncf %147 : vector<8x8xf32> to vector<8x8xbf16>
    %c0_56 = arith.constant 0 : index
    %c3 = arith.constant 3 : index
    %c0_57 = arith.constant 0 : index
    %c0_58 = arith.constant 0 : index
    %149 = vector.load %arg6[%c0_56, %c3, %c0_57, %c0_58] : memref<1x4x8x8xbf16, #tpu.memory_space<vmem>>, vector<1x1x8x8xbf16>
    %150 = vector.shape_cast %149 : vector<1x1x8x8xbf16> to vector<8x8xbf16>
    %151 = vector.shape_cast %148 : vector<8x8xbf16> to vector<1x1x8x8xbf16>
    tpu.vector_store %arg6[%c0_56, %c3, %c0_57, %c0_58], %151 {strides = array<i32>} : memref<1x4x8x8xbf16, #tpu.memory_space<vmem>>, vector<1x1x8x8xbf16>,
    %152 = vector.extract_strided_slice %14 {offsets = [0, 56], sizes = [8, 8], strides = [1, 1]} : vector<8x96xf32> to vector<8x8xf32>
    %153 = vector.extract_strided_slice %152 {offsets = [0, 0], sizes = [8, 4], strides = [1, 1]} : vector<8x8xf32> to vector<8x4xf32>
    %154 = vector.extract_strided_slice %152 {offsets = [0, 4], sizes = [8, 4], strides = [1, 1]} : vector<8x8xf32> to vector<8x4xf32>
    %155 = arith.mulf %153, %15 : vector<8x4xf32>
    %156 = arith.mulf %154, %16 : vector<8x4xf32>
    %157 = arith.addf %155, %156 : vector<8x4xf32>
    %cst_59 = arith.constant 0.000000e+00 : f32
    %158 = vector.broadcast %cst_59 : f32 to vector<8x4xf32>
    %159 = arith.subf %158, %153 : vector<8x4xf32>
    %160 = arith.mulf %159, %16 : vector<8x4xf32>
    %161 = arith.mulf %154, %15 : vector<8x4xf32>
    %162 = arith.addf %160, %161 : vector<8x4xf32>
    %163 = tpu.concatenate %157, %162 in 1 : vector<8x4xf32>, vector<8x4xf32> -> vector<8x8xf32>
    %164 = arith.truncf %163 : vector<8x8xf32> to vector<8x8xbf16>
    %c0_60 = arith.constant 0 : index
    %c3_61 = arith.constant 3 : index
    %c0_62 = arith.constant 0 : index
    %c0_63 = arith.constant 0 : index
    %165 = vector.load %arg7[%c0_60, %c3_61, %c0_62, %c0_63] : memref<1x4x8x8xbf16, #tpu.memory_space<vmem>>, vector<1x1x8x8xbf16>
    %166 = vector.shape_cast %165 : vector<1x1x8x8xbf16> to vector<8x8xbf16>
    %167 = vector.shape_cast %164 : vector<8x8xbf16> to vector<1x1x8x8xbf16>
    tpu.vector_store %arg7[%c0_60, %c3_61, %c0_62, %c0_63], %167 {strides = array<i32>} : memref<1x4x8x8xbf16, #tpu.memory_space<vmem>>, vector<1x1x8x8xbf16>,
    %168 = vector.extract_strided_slice %14 {offsets = [0, 88], sizes = [8, 8], strides = [1, 1]} : vector<8x96xf32> to vector<8x8xf32>
    %169 = arith.truncf %168 : vector<8x8xf32> to vector<8x8xbf16>
    %c0_64 = arith.constant 0 : index
    %c3_65 = arith.constant 3 : index
    %c0_66 = arith.constant 0 : index
    %c0_67 = arith.constant 0 : index
    %170 = vector.load %arg8[%c0_64, %c3_65, %c0_66, %c0_67] : memref<1x4x8x8xbf16, #tpu.memory_space<vmem>>, vector<1x1x8x8xbf16>
    %171 = vector.shape_cast %170 : vector<1x1x8x8xbf16> to vector<8x8xbf16>
    %172 = vector.shape_cast %169 : vector<8x8xbf16> to vector<1x1x8x8xbf16>
    tpu.vector_store %arg8[%c0_64, %c3_65, %c0_66, %c0_67], %172 {strides = array<i32>} : memref<1x4x8x8xbf16, #tpu.memory_space<vmem>>, vector<1x1x8x8xbf16>,
    return
  }
  func.func @transform_0(%arg0: i32, %arg1: i32) -> (i32, i32, i32) {
    %c0_i32 = arith.constant 0 : i32
    %c0_i32_0 = arith.constant 0 : i32
    return %arg0, %arg1, %c0_i32 : i32, i32, i32
  }
  func.func @transform_1(%arg0: i32, %arg1: i32) -> (i32, i32) {
    %c0_i32 = arith.constant 0 : i32
    %c0_i32_0 = arith.constant 0 : i32
    %c0_i32_1 = arith.constant 0 : i32
    return %c0_i32, %c0_i32_0 : i32, i32
  }
  func.func @transform_2(%arg0: i32, %arg1: i32) -> (i32, i32) {
    %c0_i32 = arith.constant 0 : i32
    %c0_i32_0 = arith.constant 0 : i32
    return %arg1, %c0_i32 : i32, i32
  }
  func.func @transform_3(%arg0: i32, %arg1: i32) -> (i32, i32) {
    %c0_i32 = arith.constant 0 : i32
    %c0_i32_0 = arith.constant 0 : i32
    return %arg1, %c0_i32 : i32, i32
  }
  func.func @transform_4(%arg0: i32, %arg1: i32) -> (i32, i32, i32, i32) {
    %c0_i32 = arith.constant 0 : i32
    %c0_i32_0 = arith.constant 0 : i32
    %c0_i32_1 = arith.constant 0 : i32
    return %arg0, %c0_i32, %arg1, %c0_i32_0 : i32, i32, i32, i32
  }
  func.func @transform_5(%arg0: i32, %arg1: i32) -> (i32, i32, i32, i32) {
    %c0_i32 = arith.constant 0 : i32
    %c0_i32_0 = arith.constant 0 : i32
    %c0_i32_1 = arith.constant 0 : i32
    return %arg0, %c0_i32, %arg1, %c0_i32_0 : i32, i32, i32, i32
  }
  func.func @transform_6(%arg0: i32, %arg1: i32) -> (i32, i32, i32, i32) {
    %c0_i32 = arith.constant 0 : i32
    %c0_i32_0 = arith.constant 0 : i32
    %c0_i32_1 = arith.constant 0 : i32
    return %arg0, %c0_i32, %arg1, %c0_i32_0 : i32, i32, i32, i32
  }
}

</mosaic_0001>

<bundles_post_ra>
// kernel: tpu_custom_call.1
= control target key start
LH: loop header
LB: loop body
LE: loop exit
PB: predicated region body
PF: predicated region fallthrough
CT: control target
= control target key end

     0   :  { %12 = vsyncpa [#allocation3], 0  ;;  %s2047_s0 = inlined_call_operand.hbm [shape: f32[2,8,32], index: 0, kind: input, shape index: {}]   ;;  %s2048_s1 = inlined_call_operand.hbm [shape: bf16[32,96], index: 1, kind: input, shape index: {}]   ;;  %s2049_s2 = inlined_call_operand.hbm [shape: f32[8,4], index: 2, kind: input, shape index: {}]   ;;  %s2050_s3 = inlined_call_operand.hbm [shape: f32[8,4], index: 3, kind: input, shape index: {}]   ;;  %s2051_s4 = inlined_call_operand.hbm [shape: bf16[2,4,8,8], index: 4, kind: output, shape index: {0}]   ;;  %s2052_s5 = inlined_call_operand.hbm [shape: bf16[2,4,8,8], index: 5, kind: output, shape index: {1}]   ;;  %s2053_s6 = inlined_call_operand.hbm [shape: bf16[2,4,8,8], index: 6, kind: output, shape index: {2}]  }
   0x1   :  { %14 = vsyncpa [#allocation3 + $0x1], 0 }
   0x2   :  { %15 = vsyncpa [#allocation6], 0 }
   0x3   :  { %16 = vsyncpa [#allocation9], 0 }
   0x4   :  { %17 = vsyncpa [#allocation4], 0 }
   0x5   :  { %19 = vsyncpa [#allocation4 + $0x1], 0 }
   0x6   :  { %20 = vsyncpa [#allocation12], 0 }
   0x7   :  { %22 = vsyncpa [#allocation12 + $0x1], 0  ;;  %s1538_s21 = smov 0   ;;  %s1540_s22 = smov 0  }
   0x8   :  { %s1542_s23 = smov 0   ;;  %s1544_s24 = smov 0  }
   0x9   :  { %s1546_s25 = smov 0   ;;  %s1548_s26 = smov 0  }
   0xa LB: > { %2060 = sst [smem:[#allocation19_spill]] %s1440_s21  ;;  %s1569_s27 = sadd.s32 4294967295, %s1460_s26   ;;  %s1460_s26 = sphi %s1548_s26, %s28_s26   ;;  %s1456_s25 = sphi %s1546_s25, %s2086_s25   ;;  %s1452_s24 = sphi %s1544_s24, %s2085_s24   ;;  %s1448_s23 = sphi %s1542_s23, %s2084_s23   ;;  %s1444_s22 = sphi %s1540_s22, %s2083_s22   ;;  %s1440_s21 = sphi %s1538_s21, %s2082_s21  }
   0xb   : > { %s2055_s28 = sadd.s32 4294967294, %s1460_s26   ;;  %p62_p0 = scmp.ne.s32.totalorder %s1444_s22, %s1440_s21 }
   0xc   : > { %p2054_p1 = scmp.eq.s32.totalorder %s1569_s27, 0  ;;  %p167_p3 = scmp.eq.s32.totalorder %s2055_s28, 1 }
   0xd   : > { %p1001_p5 = scmp.ge.s32.totalorder %s1460_s26, 1  ;;  %p230_p7 = scmp.lt.s32.totalorder %s1460_s26, 3 }
   0xe   : > { %p1580_p4 = por %p2054_p1, %p62_p0  ;;  %p1585_p6 = por %p167_p3, %p62_p0 }
   0xf   : > { %p1590_p8 = pnand %p1001_p5, %p230_p7  ;;  %s1462_s8 = smov [#allocation5]  }
  0x10   : > { %s2061_s29 = scalar_select %p1580_p4, 1, 0 }
  0x11   : > { %s2062_s30 = scalar_select %p1585_p6, 1, 0 }
  0x12   : > { %s2064_s7 = scalar_select %p1590_p8, 1, 0 }
  0x13   : > { %2063 = sst [smem:[#allocation20_spill]] %s2062_s30  ;;  %s242_s9 = sshll.u32 %s1462_s8, 4  ;;  %s1594_s9 = int_to_ptr.vmem [resolvable:$true] %s242_s9 }
  0x14   : > { %p1075_p9 = pneg %p1590_p8  ;;  %s1463_s11 = smov [#allocation7]  }
  0x15   : > { %s258_s12 = sshll.u32 %s1463_s11, 4  ;;  %s1464_s13 = smov [#allocation8]   ;;  %s1605_s12 = int_to_ptr.vmem [resolvable:$true] %s258_s12 }
  0x16   : > { %p1601_p11 = pnand %p1075_p9, %p2054_p1  ;;  %s1607_s14 = sshll.u32 %s1464_s13, 4  ;;  %s272_s14 = int_to_ptr.vmem [resolvable:$true] %s1607_s14 }
  0x17   : > { %s1196_s17 = scalar_lea.hbm %s2048_s1, 256 }
  0x18   : > { %p1197_p12 = scmp.ne.s32.totalorder %s2048_s1, %s1196_s17  ;;  %p1617_p13 = pneg %p1601_p11 }
  0x19   : > { %p1203_p5 = scmp.lt.u32.totalorder %s1196_s17, %s2048_s1 }
  0x1a   : > { %p1199_p0 = pnand %p1617_p13, %p1197_p12 }
  0x1c   : > { %p1200_p3 = pneg %p1199_p0 }
  0x1e   : > { %p1205_p7 = pnand %p1203_p5, %p1200_p3 }
  0x20   : > { %1208 = shalt.err (!%p1205_p7)
}
  0x21   : > { %s1209_s13 = scalar_lea.vmem %s1594_s9, 256  ;;  %p1217_p2 = scmp.lt.s32.totalorder %s1594_s9, %s1594_s9 }
  0x22   : > { %p1210_p9 = scmp.ne.s32.totalorder %s1594_s9, %s1209_s13  ;;  %p1218_p6 = scmp.lt.s32.totalorder %s1209_s13, %s1209_s13 }
  0x24   : > { %p1212_p10 = pnand %p1210_p9, %p1617_p13  ;;  %p1219_p12 = por %p1218_p6, %p1217_p2 }
  0x26   : > { %p1213_p1 = pneg %p1212_p10 }
  0x28   : > { %p1220_p0 = pnand %p1219_p12, %p1213_p1 }
  0x2a   : > { %1223 = shalt.err (!%p1220_p0)
}
  0x2b   : > { %s1465_s15 = smov 64   ;;  %s1466_s16 = smov 4  }
  0x2c   : > { %1078 = dma.hbm_to_vmem [thread:$0]  (!%p1601_p11), %s2048_s1, 256, %s1594_s9, [#allocation6], %s1465_s15, %s1465_s15, %s1466_s16  }
  0x2d   : > { %s1224_s11 = scalar_lea.hbm %s2049_s2, 128 }
  0x2e   : > { %p1225_p2 = scmp.ne.s32.totalorder %s2049_s2, %s1224_s11  ;;  %p1231_p10 = scmp.lt.u32.totalorder %s1224_s11, %s2049_s2 }
  0x30   : > { %p1227_p1 = pnand %p1225_p2, %p1617_p13 }
  0x32   : > { %p1228_p6 = pneg %p1227_p1 }
  0x34   : > { %p1233_p3 = pnand %p1231_p10, %p1228_p6 }
  0x36   : > { %1236 = shalt.err (!%p1233_p3)
}
  0x37   : > { %s1237_s9 = scalar_lea.vmem %s1605_s12, 128  ;;  %p1245_p12 = scmp.lt.s32.totalorder %s1605_s12, %s1605_s12 }
  0x38   : > { %p1238_p5 = scmp.ne.s32.totalorder %s1605_s12, %s1237_s9  ;;  %p1246_p0 = scmp.lt.s32.totalorder %s1237_s9, %s1237_s9 }
  0x3a   : > { %p1240_p7 = pnand %p1238_p5, %p1617_p13  ;;  %p1247_p2 = por %p1246_p0, %p1245_p12 }
  0x3c   : > { %p1241_p9 = pneg %p1240_p7 }
  0x3e   : > { %p1248_p1 = pnand %p1247_p2, %p1241_p9 }
  0x40   : > { %1251 = shalt.err (!%p1248_p1)
}
  0x41   : > { %1081 = dma.hbm_to_vmem [thread:$0]  (!%p1601_p11), %s2049_s2, 128, %s1605_s12, [#allocation6]  }
  0x42   : > { %s1252_s16 = scalar_lea.hbm %s2050_s3, 128 }
  0x43   : > { %p1253_p6 = scmp.ne.s32.totalorder %s2050_s3, %s1252_s16  ;;  %p1259_p5 = scmp.lt.u32.totalorder %s1252_s16, %s2050_s3 }
  0x45   : > { %p1255_p10 = pnand %p1253_p6, %p1617_p13 }
  0x47   : > { %p1256_p3 = pneg %p1255_p10 }
  0x49   : > { %p1261_p7 = pnand %p1259_p5, %p1256_p3 }
  0x4b   : > { %1264 = shalt.err (!%p1261_p7)
}
  0x4c   : > { %s1265_s11 = scalar_lea.vmem %s272_s14, 128  ;;  %p1273_p2 = scmp.lt.s32.totalorder %s272_s14, %s272_s14 }
  0x4d   : > { %p1266_p9 = scmp.ne.s32.totalorder %s272_s14, %s1265_s11  ;;  %p1274_p1 = scmp.lt.s32.totalorder %s1265_s11, %s1265_s11 }
  0x4f   : > { %p1268_p12 = pnand %p1266_p9, %p1617_p13  ;;  %p1275_p4 = por %p1274_p1, %p1273_p2 }
  0x51   : > { %p1269_p0 = pneg %p1268_p12 }
  0x53   : > { %p1276_p8 = pnand %p1275_p4, %p1269_p0 }
  0x55   : > { %1279 = shalt.err (!%p1276_p8)
}
  0x56   : > { %1084 = dma.hbm_to_vmem [thread:$0]  (!%p1601_p11), %s2050_s3, 128, %s272_s14, [#allocation9]  }
  0x57   : > { %s49_s20 = sadd.s32 1, %s1448_s23  ;;  %s40_s9 = sadd.s32 1, %s1456_s25 }
  0x58   : > { %p56_p4 = scmp.ne.s32.totalorder %s1448_s23, %s1444_s22  ;;  %p42_p8 = scmp.ge.s32.totalorder %s40_s9, 2 }
  0x59   : > { %p57_p13 = scmp.eq.s32.totalorder %s1460_s26, 0  ;;  %p2067_p6 = scmp.eq.s32.totalorder %s1569_s27, 1 }
  0x5a   : > { %p1102_p3 = scmp.lt.s32.totalorder %s1460_s26, 2  ;;  %s2088_s9 = smov (%p42_p8, %s40_s9), 0 }
  0x5b   : > { %p1687_p10 = por %p2067_p6, %p56_p4  ;;  %p58_p5 = por %p57_p13, %p56_p4 }
  0x5c   : > { %s282_s21 = sand.u32 1, %s1448_s23   ;;  %s44_s28 = ssub.s32 %s1456_s25, %s2088_s9 }
  0x5d   : > { %p47_p7 = scmp.eq.s32.totalorder %s44_s28, 0  ;;  %s1006_s14 = sshll.u32 %s282_s21, 3 }
  0x5e   : > { %s1007_s30 = sshll.u32 %s1456_s25, 7  ;;  %s286_s19 = scalar_lea.vmem [#allocation2], %s1006_s14 }
  0x5f   : > { %s1699_s15 = scalar_select %p47_p7, %s1448_s23, %s49_s20  }
  0x60   : > { %s1704_s18 = scalar_lea.hbm %s2047_s0, %s1007_s30  ;;  %s294_s8 = sshll.u32 %s286_s19, 4  ;;  %s1706_s8 = int_to_ptr.vmem [resolvable:$true] %s294_s8 }
  0x61   : > { %p1710_p11 = pnand %p1102_p3, %p58_p5  ;;  %s283_s12 = scalar_lea.sflag [#allocation3], %s282_s21 }
  0x62   : > { %s1280_s13 = scalar_lea.hbm %s1704_s18, 128  ;;  %s1285_s14 = scalar_lea.hbm %s2047_s0, 256 }
  0x63   : > { %p1281_p9 = scmp.ne.s32.totalorder %s1704_s18, %s1280_s13  ;;  %p1282_p12 = pneg %p1710_p11 }
  0x64   : > { %p1286_p1 = scmp.lt.u32.totalorder %s1704_s18, %s2047_s0  ;;  %p1287_p4 = scmp.lt.u32.totalorder %s1285_s14, %s1280_s13 }
  0x65   : > { %p1283_p0 = pnand %p1282_p12, %p1281_p9  ;;  %p1289_p13 = scmp.lt.u32.totalorder %s1280_s13, %s1704_s18 }
  0x66   : > { %p1288_p8 = por %p1287_p4, %p1286_p1 }
  0x67   : > { %p1284_p2 = pneg %p1283_p0 }
  0x68   : > { %p1290_p6 = por %p1289_p13, %p1288_p8 }
  0x6a   : > { %p1291_p3 = pnand %p1290_p6, %p1284_p2 }
  0x6c   : > { %1294 = shalt.err (!%p1291_p3)
}
  0x6d   : > { %s1295_s21 = scalar_lea.vmem %s1706_s8, 128  ;;  %s1467_s17 = smov [#allocation2]  }
  0x6e   : > { %p1296_p5 = scmp.ne.s32.totalorder %s1706_s8, %s1295_s21  ;;  %s1300_s19 = sshll.u32 %s1467_s17, 4  ;;  %s1301_s19 = int_to_ptr.vmem [resolvable:$false] %s1300_s19 }
  0x6f   : > { %s1302_s20 = scalar_lea.vmem %s1301_s19, 256  ;;  %p1303_p0 = scmp.lt.s32.totalorder %s1706_s8, %s1301_s19 }
  0x70   : > { %p1298_p7 = pnand %p1296_p5, %p1282_p12  ;;  %p1304_p1 = scmp.lt.s32.totalorder %s1302_s20, %s1295_s21 }
  0x72   : > { %p1299_p9 = pneg %p1298_p7  ;;  %p1305_p4 = por %p1304_p1, %p1303_p0 }
  0x74   : > { %p1306_p8 = pnand %p1305_p4, %p1299_p9 }
  0x76   : > { %1309 = shalt.err (!%p1306_p8)
}
  0x77   : > { %1088 = dma.hbm_to_vmem [thread:$0]  (!%p1710_p11), %s1704_s18, 128, %s1706_s8, %s283_s12  }
  0x78   : > { %p2070_p2 = scmp.ne.s32.totalorder %s2064_s7, 0 }
  0x79   : > { %s1742_s13 = sand.u32 (!%p2070_p2), 1, %s1444_s22   ;;  %p2071_p12 = scmp.ne.s32.totalorder (!%p2070_p2), %s2061_s29, 0 }
  0x7a   : > { %303 = sbr.rel (%p2070_p2) target bundleno = 827 (0x33b), region = 36  ;;  %s1009_s28 = sshll.u32 (!%p2070_p2), %s1742_s13, 3 }
  0x7b   : > { %s306_s14 = scalar_lea.sflag (!%p2070_p2), [#allocation3], %s1742_s13  ;;  %s309_s30 = scalar_lea.vmem (!%p2070_p2), [#allocation2], %s1009_s28 }
  0x81   : > { %1419 = dma.done.wait (%p2071_p12), %s306_s14, 128  }
  0x82   : > { %1421 = vsyncadd (%p2071_p12), %s306_s14, 4294967168  ;;  %p2072_p13 = scmp.eq.s32.totalorder %s1569_s27, 0 }
  0x84   : > { %1423 = dma.done.wait (%p2072_p13), [#allocation6], 384   ;;  %p2073_p11 = pmov %p2072_p13 }
  0x86   : > { %1425 = vsyncadd (%p2073_p11), [#allocation6], 4294966912  ;;  %p2074_p6 = pmov %p2073_p11 }
  0x88   : > { %1427 = dma.done.wait (%p2074_p6), [#allocation9], 128   ;;  %p2075_p3 = pmov %p2074_p6 }
  0x89   : > { %v1758_v0 = vld [vmem:[%s309_s30] sm:$0xff]  ;;  %vm363_vm0 = vcmask 261120   ;;  %v1192_v3 = vld [vmem:[#allocation5] sm:$0xff]   ;;  %v1468_v4 = vmov 0.0   ;;  %vm1469_vm1 = vmmov 0   ;;  %v1193_v5 = vld [vmem:[#allocation5 + $0x8] sm:$0xff]  }
  0x8a   : > { %1429 = vsyncadd (%p2075_p3), [#allocation9], 4294967168  ;;  %v362_v1 = vmul.f32 %v1758_v0, %v1758_v0  ;;  %1047 = vmatprep.subr.bf16.mxu0 %v1468_v4  ;;  %1051 = vmatprep.mubr.msk.bf16.mxu0 %vm1469_vm1, %v1468_v4  ;;  %v1763_v6 = vld [vmem:[#allocation8] sm:$0xff]  ;;  %s1470_s29 = smov 12   ;;  %v1766_v7 = vld [vmem:[#allocation7] sm:$0xff]  ;;  %s1471_s7 = smov 4  }
  0x8b   : > { %1048 = vmatpush3.bf16.msra.mxu0 %v1192_v3  ;;  %516 = vrot.lane.b32.xlu1 %v1763_v6, %s1470_s29  ;;  %s1472_s18 = smov 36   ;;  %s1473_s8 = smov 20   ;;  %vm465_vm2 = vcmask 60416   ;;  %vm461_vm3 = vcmask 31744  }
  0x8c   : > { %v364_v2 = vsel %vm363_vm0, %v362_v1, 0.0  ;;  %1049 = vmatprep.subr.bf16.mxu0 %v1468_v4  ;;  %s1474_s11 = smov 44   ;;  %s1475_s12 = smov 52  }
  0x8d   : > { %365 = vadd.xlane.f32.xlu0 %v364_v2  ;;  %s1476_s16 = smov 28   ;;  %s1477_s21 = smov 60  }
  0x8e   : > { %s1478_s17 = smov 8   ;;  %s1479_s19 = smov 16  }
  0x8f   : > { %1050 = vmatpush3.bf16.msra.mxu0 %v1193_v5  ;;  %529 = vrot.lane.b32.xlu1 %v1766_v7, %s1470_s29  ;;  %s1480_s20 = smov 24   ;;  %s1481_s28 = smov 32  }
  0x90   : > { %s1482_s14 = smov 40   ;;  %s1483_s30 = smov 48  }
  0x91   : > { %s1484_s29 = smov 56  }
  0x93   : > { %598 = vrot.lane.b32.xlu1 %v1763_v6, %s1473_s8 }
  0x97   : > { %611 = vrot.lane.b32.xlu1 %v1766_v7, %s1473_s8  ;;  %s1486_s8 = smov 64  }
  0x9b   : > { %680 = vrot.lane.b32.xlu1 %v1763_v6, %s1476_s16 }
  0x9f   : > { %693 = vrot.lane.b32.xlu1 %v1766_v7, %s1476_s16  ;;  %s1489_s16 = smov 104  }
  0xa3   : > { %448 = vrot.lane.b32.xlu0 %v1766_v7, %s1471_s7  ;;  %471 = vrot.lane.b32.xlu1 %v1763_v6, %s1472_s18 }
  0xa7   : > { %484 = vrot.lane.b32.xlu0 %v1766_v7, %s1472_s18  ;;  %555 = vrot.lane.b32.xlu1 %v1763_v6, %s1474_s11  ;;  %s1485_s18 = smov 124  }
  0xab   : > { %568 = vrot.lane.b32.xlu0 %v1766_v7, %s1474_s11  ;;  %637 = vrot.lane.b32.xlu1 %v1763_v6, %s1475_s12  ;;  %s1487_s11 = smov 120  }
  0xaf   : > { %650 = vrot.lane.b32.xlu0 %v1766_v7, %s1475_s12  ;;  %719 = vrot.lane.b32.xlu1 %v1763_v6, %s1477_s21  ;;  %s1488_s12 = smov 112  }
  0xb3   : > { %732 = vrot.lane.b32.xlu0 %v1766_v7, %s1477_s21  ;;  %436 = vrot.lane.b32.xlu1 %v1763_v6, %s1471_s7  ;;  %s1490_s21 = smov 116  }
  0xb7   : > { %512 = vrot.lane.b32.xlu0 %v1766_v7, %s1478_s17  ;;  %525 = vrot.lane.b32.xlu1 %v1763_v6, %s1478_s17  ;;  %s1491_s17 = smov 96  }
  0xbb   : > { %594 = vrot.lane.b32.xlu0 %v1766_v7, %s1479_s19  ;;  %607 = vrot.lane.b32.xlu1 %v1763_v6, %s1479_s19  ;;  %s1492_s19 = smov 108  }
  0xbf   : > { %676 = vrot.lane.b32.xlu0 %v1766_v7, %s1480_s20  ;;  %689 = vrot.lane.b32.xlu1 %v1763_v6, %s1480_s20  ;;  %s1493_s20 = smov 88  }
  0xc3   : > { %467 = vrot.lane.b32.xlu0 %v1766_v7, %s1481_s28  ;;  %480 = vrot.lane.b32.xlu1 %v1763_v6, %s1481_s28  ;;  %s1494_s28 = smov 100  }
  0xc7   : > { %551 = vrot.lane.b32.xlu0 %v1766_v7, %s1482_s14  ;;  %564 = vrot.lane.b32.xlu1 %v1763_v6, %s1482_s14 }
  0xcb   : > { %633 = vrot.lane.b32.xlu0 %v1766_v7, %s1483_s30  ;;  %646 = vrot.lane.b32.xlu1 %v1763_v6, %s1483_s30 }
  0xcf   : > { %715 = vrot.lane.b32.xlu0 %v1766_v7, %s1484_s29  ;;  %728 = vrot.lane.b32.xlu1 %v1763_v6, %s1484_s29 }
  0xfd   : > { %v517_v14 = vpop.permute.xlu1 %516 }
 0x101   : > { %v530_v15 = vpop.permute.xlu1 %529 }
 0x105   : > { %v599_v16 = vpop.permute.xlu1 %598 }
 0x109   : > { %v612_v17 = vpop.permute.xlu1 %611 }
 0x10d   : > { %v681_v18 = vpop.permute.xlu1 %680 }
 0x111   : > { %v694_v19 = vpop.permute.xlu1 %693 }
 0x115   : > { %v472_v27 = vpop.permute.xlu1 %471 }
 0x119   : > { %v556_v33 = vpop.permute.xlu1 %555 }
 0x11a   : > { %v366_v8 = vpop.xlane.xlu0 %365 }
 0x11b   : > { %v368_v9 = vmul.f32 0.03125, %v366_v8 }
 0x11d   : > { %v369_v10 = vadd.f32 1e-06, %v368_v9  ;;  %v638_v37 = vpop.permute.xlu1 %637 }
 0x11e   : > { %v449_v20 = vpop.permute.xlu0 %448 }
 0x11f   : > { %1194 = vrsqrt.f32 %v369_v10 }
 0x121   : > { %v720_v43 = vpop.permute.xlu1 %719 }
 0x122   : > { %v485_v32 = vpop.permute.xlu0 %484 }
 0x125   : > { %v437_v47 = vpop.permute.xlu1 %436 }
 0x126   : > { %v569_v36 = vpop.permute.xlu0 %568 }
 0x129   : > { %v1195_v11 = vpop.eup %1194  ;;  %v526_v52 = vpop.permute.xlu1 %525 }
 0x12a   : > { %v371_v12 = vmul.f32 %v1195_v11, %v1758_v0  ;;  %v651_v42 = vpop.permute.xlu0 %650 }
 0x12c   : > { %v372_v13 = vpack.c.bf16 %v371_v12, %v371_v12 }
 0x12d   : > { %v608_v54 = vpop.permute.xlu1 %607 }
 0x12e   : > { %1052 = vmatmul.mubr.msk.bf16.vlgmr.msra.gmra.mrb[0].mxu0 %vm363_vm0, %v372_v13  ;;  %v733_v46 = vpop.permute.xlu0 %732 }
 0x131   : > { %v690_v56 = vpop.permute.xlu1 %689 }
 0x132   : > { %v513_v51 = vpop.permute.xlu0 %512 }
 0x135   : > { %v481_v58 = vpop.permute.xlu1 %480 }
 0x136   : > { %v595_v53 = vpop.permute.xlu0 %594 }
 0x139   : > { %v565_v60 = vpop.permute.xlu1 %564 }
 0x13a   : > { %v677_v55 = vpop.permute.xlu0 %676 }
 0x13d   : > { %v1849_v62 = vpop.permute.xlu1 %646 }
 0x13e   : > { %v468_v57 = vpop.permute.xlu0 %467 }
 0x141   : > { %v1854_v1 = vpop.permute.xlu1 %728 }
 0x142   : > { %v552_v59 = vpop.permute.xlu0 %551 }
 0x146   : > { %v634_v61 = vpop.permute.xlu0 %633 }
 0x14a   : > { %v716_v0 = vpop.permute.xlu0 %715 }
 0x201   : > { %v1807_v21 = vpop.f32.mrb[0].mxu0 }
 0x202   : > { %v1053_v22 = vpop.f32.mrb[1].mxu0  ;;  %v519_v23 = vmul.f32 %v517_v14, %v1807_v21  ;;  %v451_v24 = vmul.f32 %v449_v20, %v1807_v21  ;;  %v601_v28 = vmul.f32 %v599_v16, %v1807_v21  ;;  %v532_v29 = vmul.f32 %v530_v15, %v1807_v21 }
 0x203   : > { %v429_v25 = vpop.f32.mrb[2].mxu0  ;;  %v683_v30 = vmul.f32 %v681_v18, %v1807_v21  ;;  %v614_v31 = vmul.f32 %v612_v17, %v1807_v21  ;;  %v474_v34 = vmul.f32 %v472_v27, %v1807_v21  ;;  %v696_v35 = vmul.f32 %v694_v19, %v1807_v21 }
 0x204   : > { %521 = vrot.lane.b32.xlu1 %v519_v23, %s1485_s18  ;;  %v1054_v26 = vpop.f32.mrb[3].mxu0  ;;  %453 = vrot.lane.b32.xlu0 %v451_v24, %s1485_s18  ;;  %v558_v38 = vmul.f32 %v556_v33, %v1807_v21  ;;  %v487_v39 = vmul.f32 %v485_v32, %v1807_v21  ;;  %v640_v40 = vmul.f32 %v638_v37, %v1807_v21  ;;  %v1852_v63 = vsub.f32 0.0, %v1807_v21 }
 0x205   : > { %v571_v41 = vmul.f32 %v569_v36, %v1807_v21  ;;  %v722_v44 = vmul.f32 %v720_v43, %v1807_v21  ;;  %v653_v45 = vmul.f32 %v651_v42, %v1807_v21  ;;  %v439_v48 = vmul.f32 %v437_v47, %v1807_v21 }
 0x206   : > { %v735_v49 = vmul.f32 %v733_v46, %v1807_v21  ;;  %v1843_v50 = vpack.c.bf16 %v1807_v21, %v1807_v21  ;;  %v515_v2 = vmul.f32 %v513_v51, %v1807_v21  ;;  %v446_v3 = vmul.f32 %v1852_v63, %v1763_v6 }
 0x207   : > { %v597_v10 = vmul.f32 %v595_v53, %v1807_v21  ;;  %v528_v11 = vmul.f32 %v526_v52, %v1852_v63  ;;  %v679_v6 = vmul.f32 %v677_v55, %v1807_v21  ;;  %v610_v16 = vmul.f32 %v608_v54, %v1852_v63 }
 0x208   : > { %603 = vrot.lane.b32.xlu1 %v601_v28, %s1485_s18  ;;  %534 = vrot.lane.b32.xlu0 %v532_v29, %s1485_s18  ;;  %v470_v22 = vmul.f32 %v468_v57, %v1807_v21  ;;  %v692_v23 = vmul.f32 %v690_v56, %v1852_v63  ;;  %v554_v28 = vmul.f32 %v552_v59, %v1807_v21 }
 0x209   : > { %v483_v29 = vmul.f32 %v481_v58, %v1852_v63  ;;  %v731_v46 = vmul.f32 %v1854_v1, %v1852_v63  ;;  %v434_v47 = vmul.f32 %v1766_v7, %v1807_v21 }
 0x20c   : > { %685 = vrot.lane.b32.xlu1 %v683_v30, %s1485_s18  ;;  %616 = vrot.lane.b32.xlu0 %v614_v31, %s1485_s18 }
 0x210   : > { %476 = vrot.lane.b32.xlu1 %v474_v34, %s1485_s18  ;;  %698 = vrot.lane.b32.xlu0 %v696_v35, %s1485_s18  ;;  %v636_v34 = vmul.f32 %v634_v61, %v1807_v21  ;;  %v567_v35 = vmul.f32 %v565_v60, %v1852_v63 }
 0x214   : > { %560 = vrot.lane.b32.xlu1 %v558_v38, %s1485_s18  ;;  %489 = vrot.lane.b32.xlu0 %v487_v39, %s1485_s18 }
 0x218   : > { %642 = vrot.lane.b32.xlu1 %v640_v40, %s1485_s18  ;;  %573 = vrot.lane.b32.xlu0 %v571_v41, %s1485_s18  ;;  %v718_v40 = vmul.f32 %v716_v0, %v1807_v21  ;;  %v649_v41 = vmul.f32 %v1849_v62, %v1852_v63 }
 0x21c   : > { %724 = vrot.lane.b32.xlu1 %v722_v44, %s1485_s18  ;;  %655 = vrot.lane.b32.xlu0 %v653_v45, %s1485_s18 }
 0x220   : > { %441 = vrot.lane.b32.xlu1 %v439_v48, %s1485_s18  ;;  %737 = vrot.lane.b32.xlu0 %v735_v49, %s1485_s18 }
 0x224   : > { %508 = vrot.lane.b32.xlu1 %v1843_v50, %s1486_s8  ;;  %589 = vrot.lane.b32.xlu0 %v1843_v50, %s1484_s29  ;;  %s1495_s29 = smov 80  }
 0x276   : > { %v522_v4 = vpop.permute.xlu1 %521  ;;  %v454_v5 = vpop.permute.xlu0 %453 }
 0x277   : > { %v524_v8 = vadd.f32 %v522_v4, %v515_v2  ;;  %v456_v9 = vadd.f32 %v454_v5, %v446_v3 }
 0x279   : > { %539 = vrot.lane.b32.xlu1 %v524_v8, %s1487_s11  ;;  %458 = vrot.lane.b32.xlu0 %v456_v9, %s1471_s7  ;;  %s1497_s11 = smov 72  }
 0x27a   : > { %v604_v12 = vpop.permute.xlu1 %603  ;;  %v535_v13 = vpop.permute.xlu0 %534 }
 0x27b   : > { %v606_v14 = vadd.f32 %v604_v12, %v597_v10  ;;  %v537_v15 = vadd.f32 %v535_v13, %v528_v11 }
 0x27d   : > { %621 = vrot.lane.b32.xlu1 %v606_v14, %s1488_s12  ;;  %543 = vrot.lane.b32.xlu0 %v537_v15, %s1485_s18  ;;  %s1496_s18 = smov 92   ;;  %s1498_s12 = smov 84  }
 0x27e   : > { %v686_v17 = vpop.permute.xlu1 %685  ;;  %v617_v18 = vpop.permute.xlu0 %616 }
 0x27f   : > { %v688_v19 = vadd.f32 %v686_v17, %v679_v6  ;;  %v619_v20 = vadd.f32 %v617_v18, %v610_v16 }
 0x281   : > { %703 = vrot.lane.b32.xlu1 %v688_v19, %s1489_s16  ;;  %625 = vrot.lane.b32.xlu0 %v619_v20, %s1490_s21  ;;  %s1879_s16 = sshll.u32 %s1742_s13, 4  ;;  %s1499_s21 = smov 76  }
 0x282   : > { %v477_v24 = vpop.permute.xlu1 %476  ;;  %v699_v25 = vpop.permute.xlu0 %698 }
 0x283   : > { %v479_v26 = vadd.f32 %v477_v24, %v470_v22  ;;  %v701_v27 = vadd.f32 %v699_v25, %v692_v23 }
 0x285   : > { %494 = vrot.lane.b32.xlu1 %v479_v26, %s1491_s17  ;;  %707 = vrot.lane.b32.xlu0 %v701_v27, %s1492_s19  ;;  %s1884_s17 = scalar_lea.vmem [#allocation13], %s1879_s16  ;;  %s1900_s19 = sshll.u32 %s1452_s24, 8 }
 0x286   : > { %v561_v30 = vpop.permute.xlu1 %560  ;;  %v490_v31 = vpop.permute.xlu0 %489 }
 0x287   : > { %v563_v32 = vadd.f32 %v561_v30, %v554_v28  ;;  %v492_v33 = vadd.f32 %v490_v31, %v483_v29 }
 0x289   : > { %578 = vrot.lane.b32.xlu1 %v563_v32, %s1493_s20  ;;  %498 = vrot.lane.b32.xlu0 %v492_v33, %s1494_s28 }
 0x28a   : > { %v643_v36 = vpop.permute.xlu1 %642  ;;  %v574_v37 = vpop.permute.xlu0 %573 }
 0x28b   : > { %v645_v38 = vadd.f32 %v643_v36, %v636_v34  ;;  %v576_v39 = vadd.f32 %v574_v37, %v567_v35 }
 0x28d   : > { %660 = vrot.lane.b32.xlu1 %v645_v38, %s1495_s29  ;;  %582 = vrot.lane.b32.xlu0 %v576_v39, %s1496_s18  ;;  %s1909_s29 = scalar_lea.hbm %s2051_s4, %s1900_s19 }
 0x28e   : > { %v725_v42 = vpop.permute.xlu1 %724  ;;  %v656_v43 = vpop.permute.xlu0 %655 }
 0x28f   : > { %v727_v44 = vadd.f32 %v725_v42, %v718_v40  ;;  %v658_v45 = vadd.f32 %v656_v43, %v649_v41 }
 0x291   : > { %742 = vrot.lane.b32.xlu1 %v727_v44, %s1497_s11  ;;  %664 = vrot.lane.b32.xlu0 %v658_v45, %s1498_s12  ;;  %s1500_s11 = smov [#allocation10]  }
 0x292   : > { %v442_v48 = vpop.permute.xlu1 %441  ;;  %v738_v49 = vpop.permute.xlu0 %737  ;;  %s1314_s12 = sshll.u32 %s1500_s11, 4  ;;  %s1315_s12 = int_to_ptr.vmem [resolvable:$false] %s1314_s12 }
 0x293   : > { %v444_v51 = vadd.f32 %v442_v48, %v434_v47  ;;  %v740_v52 = vadd.f32 %v738_v49, %v731_v46 }
 0x295   : > { %671 = vrot.lane.b32.xlu1 %v1843_v50, %s1483_s30  ;;  %746 = vrot.lane.b32.xlu0 %v740_v52, %s1499_s21  ;;  %s345_s30 = scalar_lea.vmem [#allocation10], %s1879_s16  ;;  %s1316_s21 = scalar_lea.vmem %s1315_s12, 512 }
 0x296   : > { %v509_v53 = vpop.permute.xlu1 %508  ;;  %v590_v54 = vpop.permute.xlu0 %589 }
 0x297   : > { %511 = vst.msk [vmem:[%s1884_s17] sm:$0xf] %vm465_vm2, %v509_v53  ;;  %1022 = vst.msk [vmem:[%s1884_s17 + $0x4] sm:$0xf] %vm465_vm2, %v590_v54 }
 0x299   : > { %753 = vrot.lane.b32.xlu0 %v1843_v50, %s1482_s14  ;;  %s783_s14 = sshll.u32 %s345_s30, 4  ;;  %s1903_s14 = int_to_ptr.vmem [resolvable:$true] %s783_s14 }
 0x29a   : > { %s1310_s18 = scalar_lea.vmem %s1903_s14, 256  ;;  %p1317_p0 = scmp.lt.s32.totalorder %s1903_s14, %s1315_s12 }
 0x29b   : > { %p1311_p5 = scmp.ne.s32.totalorder %s1903_s14, %s1310_s18  ;;  %p1318_p1 = scmp.lt.s32.totalorder %s1316_s21, %s1310_s18 }
 0x29d   : > { %p1312_p7 = pnand %p1311_p5, %p1687_p10  ;;  %p1319_p4 = por %p1318_p1, %p1317_p0 }
 0x29f   : > { %p1313_p9 = pneg %p1312_p7 }
 0x2a1   : > { %p1320_p8 = pnand %p1319_p4, %p1313_p9 }
 0x2eb   : > { %v540_v7 = vpop.permute.xlu1 %539  ;;  %v459_v21 = vpop.permute.xlu0 %458 }
 0x2ec   : > { %v462_v55 = vsel %vm461_vm3, %v444_v51, %v459_v21 }
 0x2ed   : > { %v463_v56 = vmul.f32 0.35355338, %v462_v55 }
 0x2ef   : > { %v464_v57 = vpack.c.bf16 %v463_v56, %v463_v56  ;;  %v622_v58 = vpop.permute.xlu1 %621  ;;  %v544_v59 = vpop.permute.xlu0 %543 }
 0x2f0   : > { %v546_v60 = vsel %vm461_vm3, %v540_v7, %v544_v59 }
 0x2f1   : > { %466 = vst.msk [vmem:[%s345_s30] sm:$0xf] %vm465_vm2, %v464_v57  ;;  %v547_v61 = vmul.f32 0.35355338, %v546_v60 }
 0x2f3   : > { %v548_v62 = vpack.c.bf16 %v547_v61, %v547_v61  ;;  %v704_v63 = vpop.permute.xlu1 %703  ;;  %v626_v0 = vpop.permute.xlu0 %625 }
 0x2f4   : > { %v628_v50 = vsel %vm461_vm3, %v622_v58, %v626_v0 }
 0x2f5   : > { %1020 = vst.msk [vmem:[%s345_s30 + $0x4] sm:$0xf] %vm465_vm2, %v548_v62  ;;  %v629_v1 = vmul.f32 0.35355338, %v628_v50 }
 0x2f7   : > { %v630_v2 = vpack.c.bf16 %v629_v1, %v629_v1  ;;  %v495_v3 = vpop.permute.xlu1 %494  ;;  %v708_v4 = vpop.permute.xlu0 %707 }
 0x2f8   : > { %v710_v5 = vsel %vm461_vm3, %v704_v63, %v708_v4 }
 0x2f9   : > { %1023 = vst.msk [vmem:[%s345_s30 + $0x8] sm:$0xf] %vm465_vm2, %v630_v2  ;;  %v711_v8 = vmul.f32 0.35355338, %v710_v5 }
 0x2fb   : > { %v712_v9 = vpack.c.bf16 %v711_v8, %v711_v8  ;;  %v579_v10 = vpop.permute.xlu1 %578  ;;  %v499_v11 = vpop.permute.xlu0 %498 }
 0x2fc   : > { %v501_v12 = vsel %vm461_vm3, %v495_v3, %v499_v11 }
 0x2fd   : > { %1026 = vst.msk [vmem:[%s345_s30 + $0xc] sm:$0xf] %vm465_vm2, %v712_v9  ;;  %v502_v13 = vpack.c.bf16 %v501_v12, %v501_v12 }
 0x2fe   : > { %1323 = shalt.err (!%p1320_p8)
}
 0x2ff   : > { %s1324_s30 = scalar_lea.hbm %s1909_s29, 256  ;;  %s1328_s11 = scalar_lea.hbm %s2051_s4, 512 }
 0x300   : > { %p1325_p2 = scmp.ne.s32.totalorder %s1909_s29, %s1324_s30  ;;  %p1329_p11 = scmp.lt.u32.totalorder %s1909_s29, %s2051_s4 }
 0x301   : > { %p1330_p6 = scmp.lt.u32.totalorder %s1328_s11, %s1324_s30  ;;  %p1332_p5 = scmp.lt.u32.totalorder %s1324_s30, %s1909_s29 }
 0x302   : > { %p1326_p12 = pnand %p1325_p2, %p1687_p10 }
 0x303   : > { %p1331_p3 = por %p1330_p6, %p1329_p11 }
 0x304   : > { %p1327_p13 = pneg %p1326_p12 }
 0x305   : > { %p1333_p7 = por %p1332_p5, %p1331_p3 }
 0x307   : > { %p1334_p9 = pnand %p1333_p7, %p1327_p13 }
 0x309   : > { %1337 = shalt.err (!%p1334_p9)
}
 0x30a   : > { %s2076_s18 = scalar_lea.sflag [#allocation4], %s1742_s13  ;;  %s352_s24 = scalar_lea.vmem [#allocation11], %s1879_s16  ;;  %v661_v14 = vpop.permute.xlu1 %660  ;;  %v583_v15 = vpop.permute.xlu0 %582 }
 0x30b   : > { %1069 = dma.vmem_to_hbm [thread:$0]  (%p1687_p10), %s1903_s14, 256, %s1909_s29, %s2076_s18, %s1486_s8, %s1486_s8, %s1471_s7   ;;  %v585_v6 = vsel %vm461_vm3, %v579_v10, %v583_v15 }
 0x30c   : > { %503 = vst.msk [vmem:[%s352_s24] sm:$0xf] %vm465_vm2, %v502_v13  ;;  %v586_v16 = vpack.c.bf16 %v585_v6, %v585_v6  ;;  %s800_s13 = sshll.u32 %s352_s24, 4  ;;  %s763_s16 = sand.u32 1, %s1569_s27   ;;  %s1948_s13 = int_to_ptr.vmem [resolvable:$true] %s800_s13 }
 0x30d   : > { %s817_s14 = sshll.u32 %s1884_s17, 4  ;;  %s1957_s27 = scalar_lea.hbm %s2052_s5, %s1900_s19  ;;  %s1959_s14 = int_to_ptr.vmem [resolvable:$true] %s817_s14 }
 0x30e   : > { %1021 = vst.msk [vmem:[%s352_s24 + $0x4] sm:$0xf] %vm465_vm2, %v586_v16  ;;  %v743_v17 = vpop.permute.xlu1 %742  ;;  %v665_v18 = vpop.permute.xlu0 %664  ;;  %s1965_s28 = scalar_lea.hbm %s2053_s6, %s1900_s19  ;;  %s1970_s11 = scalar_lea.sflag [#allocation12], %s763_s16 }
 0x30f   : > { %v667_v19 = vsel %vm461_vm3, %v661_v14, %v665_v18  ;;  %s1338_s12 = scalar_lea.vmem %s1948_s13, 256  ;;  %s1501_s18 = smov [#allocation11]  }
 0x310   : > { %v668_v20 = vpack.c.bf16 %v667_v19, %v667_v19  ;;  %p1339_p0 = scmp.ne.s32.totalorder %s1948_s13, %s1338_s12  ;;  %s1342_s29 = sshll.u32 %s1501_s18, 4  ;;  %s1343_s29 = int_to_ptr.vmem [resolvable:$false] %s1342_s29 }
 0x311   : > { %s1344_s21 = scalar_lea.vmem %s1343_s29, 512  ;;  %p1345_p8 = scmp.lt.s32.totalorder %s1948_s13, %s1343_s29 }
 0x312   : > { %1024 = vst.msk [vmem:[%s352_s24 + $0x8] sm:$0xf] %vm465_vm2, %v668_v20  ;;  %v672_v22 = vpop.permute.xlu1 %671  ;;  %v747_v23 = vpop.permute.xlu0 %746  ;;  %p1340_p1 = pnand %p1339_p0, %p1687_p10  ;;  %p1346_p2 = scmp.lt.s32.totalorder %s1344_s21, %s1338_s12 }
 0x313   : > { %1025 = vst.msk [vmem:[%s1884_s17 + $0x8] sm:$0xf] %vm465_vm2, %v672_v22  ;;  %v749_v24 = vsel %vm461_vm3, %v743_v17, %v747_v23 }
 0x314   : > { %v750_v25 = vpack.c.bf16 %v749_v24, %v749_v24  ;;  %p1341_p4 = pneg %p1340_p1  ;;  %p1347_p12 = por %p1346_p2, %p1345_p8 }
 0x316   : > { %1027 = vst.msk [vmem:[%s352_s24 + $0xc] sm:$0xf] %vm465_vm2, %v750_v25  ;;  %v754_v26 = vpop.permute.xlu0 %753  ;;  %p1348_p13 = pnand %p1347_p12, %p1341_p4 }
 0x317   : > { %1028 = vst.msk [vmem:[%s1884_s17 + $0xc] sm:$0xf] %vm465_vm2, %v754_v26 }
 0x318   : > { %1351 = shalt.err (!%p1348_p13)
}
 0x319   : > { %s1352_s17 = scalar_lea.hbm %s1957_s27, 256  ;;  %s1356_s16 = scalar_lea.hbm %s2052_s5, 512 }
 0x31a   : > { %p1353_p11 = scmp.ne.s32.totalorder %s1957_s27, %s1352_s17  ;;  %p1357_p5 = scmp.lt.u32.totalorder %s1957_s27, %s2052_s5 }
 0x31b   : > { %p1358_p7 = scmp.lt.u32.totalorder %s1356_s16, %s1352_s17  ;;  %p1360_p0 = scmp.lt.u32.totalorder %s1352_s17, %s1957_s27 }
 0x31c   : > { %p1354_p6 = pnand %p1353_p11, %p1687_p10 }
 0x31d   : > { %p1359_p9 = por %p1358_p7, %p1357_p5 }
 0x31e   : > { %p1355_p3 = pneg %p1354_p6 }
 0x31f   : > { %p1361_p1 = por %p1360_p0, %p1359_p9 }
 0x321   : > { %p1362_p4 = pnand %p1361_p1, %p1355_p3 }
 0x323   : > { %1365 = shalt.err (!%p1362_p4)
}
 0x324   : > { %1070 = dma.vmem_to_hbm [thread:$0]  (%p1687_p10), %s1948_s13, 256, %s1957_s27, %s1970_s11, %s1486_s8, %s1486_s8, %s1471_s7  }
 0x325   : > { %s1366_s12 = scalar_lea.vmem %s1959_s14, 256  ;;  %s1502_s18 = smov [#allocation13]  }
 0x326   : > { %p1367_p8 = scmp.ne.s32.totalorder %s1959_s14, %s1366_s12  ;;  %s1370_s29 = sshll.u32 %s1502_s18, 4  ;;  %s1371_s29 = int_to_ptr.vmem [resolvable:$false] %s1370_s29 }
 0x327   : > { %s1372_s21 = scalar_lea.vmem %s1371_s29, 512  ;;  %p1373_p13 = scmp.lt.s32.totalorder %s1959_s14, %s1371_s29 }
 0x328   : > { %p1368_p2 = pnand %p1367_p8, %p1687_p10  ;;  %p1374_p11 = scmp.lt.s32.totalorder %s1372_s21, %s1366_s12 }
 0x32a   : > { %p1369_p12 = pneg %p1368_p2  ;;  %p1375_p6 = por %p1374_p11, %p1373_p13 }
 0x32c   : > { %p1376_p3 = pnand %p1375_p6, %p1369_p12 }
 0x32e   : > { %1379 = shalt.err (!%p1376_p3)
}
 0x32f   : > { %s1380_s13 = scalar_lea.hbm %s1965_s28, 256  ;;  %s1384_s19 = scalar_lea.hbm %s2053_s6, 512 }
 0x330   : > { %p1381_p5 = scmp.ne.s32.totalorder %s1965_s28, %s1380_s13  ;;  %p1385_p0 = scmp.lt.u32.totalorder %s1965_s28, %s2053_s6 }
 0x331   : > { %p1386_p1 = scmp.lt.u32.totalorder %s1384_s19, %s1380_s13  ;;  %p1388_p8 = scmp.lt.u32.totalorder %s1380_s13, %s1965_s28 }
 0x332   : > { %p1382_p7 = pnand %p1381_p5, %p1687_p10 }
 0x333   : > { %p1387_p4 = por %p1386_p1, %p1385_p0 }
 0x334   : > { %p1383_p9 = pneg %p1382_p7 }
 0x335   : > { %p1389_p2 = por %p1388_p8, %p1387_p4 }
 0x337   : > { %p1390_p12 = pnand %p1389_p2, %p1383_p9 }
 0x339   : > { %1393 = shalt.err (!%p1390_p12)
}
 0x33a   : > { %1071 = dma.vmem_to_hbm [thread:$0]  (%p1687_p10), %s1959_s14, 256, %s1965_s28, %s1970_s11, %s1486_s8, %s1486_s8, %s1471_s7  }
 0x33b PF: > { %s2077_s30 = sld [smem:[#allocation19_spill]]  ;;  %s2078_s20 = sld [smem:[#allocation20_spill]] }
 0x33c   : > { %p2080_p11 = scmp.ge.s32.totalorder %s1460_s26, 2 }
 0x341   : > { %s832_s12 = sand.u32 1, %s2077_s30   ;;  %p2079_p13 = scmp.ne.s32.totalorder %s2078_s20, 0 }
 0x342   : > { %s833_s18 = scalar_lea.sflag [#allocation4], %s832_s12 }
 0x343   : > { %p1090_p6 = pnand %p2080_p11, %p2079_p13 }
 0x345   : > { %1431 = dma.done.wait (!%p1090_p6), %s833_s18, 256  }
 0x346   : > { %1433 = vsyncadd (!%p1090_p6), %s833_s18, 4294967040  ;;  %s2081_s10 = sadd.s32 4294967294, %s1460_s26  }
 0x347   : > { %s841_s29 = sand.u32 1, %s2081_s10  }
 0x348   : > { %s842_s21 = scalar_lea.sflag [#allocation12], %s841_s29 }
 0x349   : > { %1435 = dma.done.wait (!%p1090_p6), %s842_s21, 512  }
 0x34a   : > { %1437 = vsyncadd (!%p1090_p6), %s842_s21, 4294966784  ;;  %s28_s26 = sadd.s32 1, %s1460_s26   ;;  %s2082_s21 = smov %s1444_s22 }
 0x34b   : > { %p25_p10 = scmp.ge.s32.totalorder %s28_s26, 4   ;;  %s2083_s22 = smov %s1448_s23 }
 0x34c   : > { %s2084_s23 = smov %s1699_s15  ;;  %s2085_s24 = smov %s1456_s25 }
 0x34d   : > { %s2086_s25 = smov %s2088_s9  ;;  %27 = sbr.rel (!%p25_p10) target bundleno = 10 (0xa), region = 136 }
 0x354   :  { %856 = vsyncpa [#allocation3], 1 }
 0x355   :  { %858 = vsyncpa [#allocation3 + $0x1], 1 }
 0x356   :  { %859 = vsyncpa [#allocation6], 1 }
 0x357   :  { %860 = vsyncpa [#allocation9], 1 }
 0x358   :  { %861 = vsyncpa [#allocation4], 1 }
 0x359   :  { %863 = vsyncpa [#allocation4 + $0x1], 1 }
 0x35a   :  { %864 = vsyncpa [#allocation12], 1 }
 0x35b   :  { %866 = vsyncpa [#allocation12 + $0x1], 1 }

</bundles_post_ra>
